<compile_context>
chip_gen: v7x
topology: tpu7x:2x2x1
jax: 0.10.0
libtpu: 0.0.40
codegen_flags: <defaults>
</compile_context>

<pallas_src>
import jax
import jax.numpy as jnp
from jax.experimental import pallas as pl
from jax.experimental.pallas import tpu as pltpu


_MAX_TILE_HW = 32768     # pixels (lanes) per grid step; multiple of 128
_MIN_SPLIT_TILE = 2048   # don't halve the tile below this just to split cores


def _choose_tiling(hw):
    """Pick (tile, num_tiles): tile is a multiple of 128, num_tiles=ceil(hw/tile).

    Prefers a tile that divides hw exactly (no partial blocks).  For awkward
    hw it keeps the large capped tile and relies on a masked partial tail
    block (only the labels get padded, never the logits)."""
    cap = min(_MAX_TILE_HW, ((hw + 127) // 128) * 128)
    tile = cap
    if hw % 128 == 0:
        for t in range(cap, 0, -128):
            if hw % t == 0:
                tile = t
                break
            if t < 1024:          # don't degrade to tiny exact tiles;
                tile = cap        # take the masked-tail path instead
                break
    num_tiles = pl.cdiv(hw, tile)
    # Prefer an even tile count so the pixel axis can be split across the two
    # TensorCores of a v7x megacore even when the batch is 1 / small / odd.
    if num_tiles % 2 == 1 and tile % 256 == 0 and tile // 2 >= _MIN_SPLIT_TILE:
        t2 = tile // 2
        n2 = pl.cdiv(hw, t2)
        if n2 % 2 == 0:
            tile, num_tiles = t2, n2
    return tile, num_tiles


def _make_ce_kernel(num_mod):
    """Kernel computing per-modality CE sums plus the valid-pixel count.

    Refs (per grid step (n, half, t)):
      labels_ref : (1, 1, TILE) int32, lane-dense
      logit refs : num_mod x (1, C, TILE) native dtype (up-cast in kernel)
      out_ref    : (1, 1, num_mod+1, 128) f32 — written only in the epilogue
      acc_ref    : VMEM scratch (num_mod+1, TILE) f32 — resident per-lane sums
    """

    def kernel(labels_ref, *args):
        logit_refs = args[:num_mod]
        out_ref = args[num_mod]
        acc_ref = args[num_mod + 1]
        _, n_cls, tile = logit_refs[0].shape
        t = pl.program_id(2)

        @pl.when(t == 0)
        def _init():
            acc_ref[...] = jnp.zeros_like(acc_ref)

        # ---- per-tile quantities shared by every modality (hoisted) ----
        lbl = labels_ref[0]                               # (1, TILE) int32
        valid = lbl >= 0                                  # negatives ignored
        validf = valid.astype(jnp.float32)
        cls = jax.lax.broadcasted_iota(jnp.int32, (n_cls, tile), 0)
        onehot = cls == lbl                               # (C, TILE)

        # ---- per-modality logsumexp pieces; the log is batched below ----
        sum_exps = []
        max_minus_picked = []
        for j in range(num_mod):
            x = logit_refs[j][0].astype(jnp.float32)      # (C, TILE)
            m = jnp.max(x, axis=0, keepdims=True)         # (1, TILE)
            se = jnp.sum(jnp.exp(x - m), axis=0, keepdims=True)
            picked = jnp.sum(jnp.where(onehot, x, 0.0),
                             axis=0, keepdims=True)       # (1, TILE)
            sum_exps.append(se)
            max_minus_picked.append(m - picked)

        # single EUP log over all modalities at once (sublane-dense)
        log_se = jnp.log(jnp.concatenate(sum_exps, axis=0))   # (num_mod, TILE)

        # ---- accumulate per-lane partial sums into the resident scratch ----
        for j in range(num_mod):
            ce_j = log_se[j:j + 1, :] + max_minus_picked[j]    # (1, TILE)
            acc_ref[j:j + 1, :] += jnp.where(valid, ce_j, 0.0)
        acc_ref[num_mod:num_mod + 1, :] += validf              # valid count

        # ---- epilogue: fold lanes down to one 128-wide output block ----
        @pl.when(t == pl.num_programs(2) - 1)
        def _flush():
            r = acc_ref[:, 0:128]
            for c in range(1, tile // 128):
                r = r + acc_ref[:, c * 128:(c + 1) * 128]
            out_ref[...] = r[None, None, :, :]

    return kernel


def _ce_sums(labels_nhw, logits_list):
    """Per-modality sums of per-pixel CE and the valid-pixel count.

    One fused pallas_call over all modalities; labels DMA'd once per tile."""
    num_mod = len(logits_list)
    N, C, H, W = logits_list[0].shape
    HW = H * W
    M1 = num_mod + 1

    tile, num_tiles = _choose_tiling(HW)
    hw_lbl = num_tiles * tile

    labels_flat = labels_nhw.reshape(N, 1, HW).astype(jnp.int32)   # free view
    if hw_lbl != HW:
        # pad ONLY the labels (tiny); logits tail blocks are masked in-kernel
        labels_flat = jnp.pad(labels_flat, ((0, 0), (0, 0), (0, hw_lbl - HW)),
                              constant_values=-1)
    logits_flat = [lg.reshape(N, C, HW) for lg in logits_list]     # free views

    n_splits = 2 if (num_tiles % 2 == 0) else 1
    tps = num_tiles // n_splits          # tiles per split (reduction length)
    grid = (N, n_splits, tps)

    logits_spec = pl.BlockSpec((1, C, tile),
                               lambda n, h, t: (n, 0, h * tps + t))
    labels_spec = pl.BlockSpec((1, 1, tile),
                               lambda n, h, t: (n, 0, h * tps + t))
    out_spec = pl.BlockSpec((1, 1, M1, 128), lambda n, h, t: (n, h, 0, 0))

    out = pl.pallas_call(
        _make_ce_kernel(num_mod),
        out_shape=jax.ShapeDtypeStruct((N, n_splits, M1, 128), jnp.float32),
        grid_spec=pltpu.PrefetchScalarGridSpec(
            num_scalar_prefetch=0,
            grid=grid,
            in_specs=[labels_spec] + [logits_spec] * num_mod,
            out_specs=out_spec,
            scratch_shapes=[pltpu.VMEM((M1, tile), jnp.float32)],
        ),
        compiler_params=pltpu.CompilerParams(
            dimension_semantics=("parallel", "parallel", "arbitrary")),
    )(labels_flat, *logits_flat)

    sums = jnp.sum(out, axis=(0, 1, 3))       # (num_mod + 1,) — tiny reduce
    return sums[:num_mod], sums[num_mod]


@jax.jit
def multi_cross_entropy_mean(logits_list, labels):
    """Mean cross-entropy for each logits tensor in one fused pallas_call."""
    ce_sums, n_valid = _ce_sums(labels, logits_list)
    return ce_sums / jnp.maximum(n_valid, 1.0)


def cross_entropy_mean(logits_nchw, labels_nhw):
    """Mean CE equivalent to F.cross_entropy(logits, labels) (ignore < 0)."""
    return multi_cross_entropy_mean([logits_nchw], labels_nhw)[0]


class TempoModalLoss:
    """JAX/Pallas port of geoseg.losses.tempo_modal.TempoModalLoss forward."""

    def __init__(self, main_loss, auxiliary_losses=None,
                 auxiliary_loss_weights={'s1': 0.5, 's2': 0.5, 'planet': 0.5},
                 host_sync_main=True):
        # host_sync_main=True mirrors PyTorch's loss.item() for 'main'.
        # Set False in a training step so the host never blocks before the
        # backward/optimizer work is dispatched.
        self.main_loss = main_loss
        self.aux_losses = auxiliary_losses
        self.auxiliary_loss_weights = auxiliary_loss_weights
        self.host_sync_main = host_sync_main

    def __call__(self, forward_dict, labels):
        logit_main = forward_dict['logits']

        mods = []
        if self.aux_losses:
            mods = list(forward_dict['non_empty_modalities'])

        fusable = (
            self.main_loss is cross_entropy_mean
            and bool(mods)
            and all(self.aux_losses.get(m) is cross_entropy_mean for m in mods)
        )

        if fusable:
            # one pallas_call for main + all aux modalities
            logits_list = [logit_main] + [forward_dict[f'{m}_aux'] for m in mods]
            losses = multi_cross_entropy_mean(logits_list, labels)
            main = losses[0]
            total = main
            loss_out = {}
            for j, modality in enumerate(mods):
                aux_loss = (self.auxiliary_loss_weights[modality]
                            * losses[1 + j])
                loss_out[modality] = aux_loss
                total = total + aux_loss
            loss_out['all'] = total
            # host sync last, after all device work has been queued
            loss_out['main'] = float(main) if self.host_sync_main else main
            return loss_out

        # generic path: arbitrary user-supplied loss callables (matches the
        # original module structure one-to-one)
        # TODO(synk): user-supplied torch loss callables must be re-expressed
        # in JAX; only the cross-entropy case is provided as a Pallas kernel.
        loss = self.main_loss(logit_main, labels)
        loss_out = {'all': loss}
        if self.aux_losses:
            for modality in mods:
                logits_aux = forward_dict[f'{modality}_aux']
                aux_loss = (self.auxiliary_loss_weights[modality]
                            * self.aux_losses[modality](logits_aux, labels))
                loss_out[modality] = aux_loss
                loss_out['all'] = loss_out['all'] + aux_loss
        loss_out['main'] = float(loss) if self.host_sync_main else loss
        return loss_out


if __name__ == "__main__":
    # small deterministic example: batch=2, classes=4, spatial=16x16
    key = jax.random.PRNGKey(0)
    k_main, k_s1, k_s2, k_pl, k_lbl = jax.random.split(key, 5)

    N, C, H, W = 2, 4, 16, 16
    logits_main = jax.random.normal(k_main, (N, C, H, W), dtype=jnp.float32)
    logits_s1 = jax.random.normal(k_s1, (N, C, H, W), dtype=jnp.float32)
    logits_s2 = jax.random.normal(k_s2, (N, C, H, W), dtype=jnp.float32)
    logits_planet = jax.random.normal(k_pl, (N, C, H, W), dtype=jnp.float32)
    labels = jax.random.randint(k_lbl, (N, H, W), 0, C, dtype=jnp.int32)

    forward_dict = {
        'logits': logits_main,
        'non_empty_modalities': ['s1', 's2', 'planet'],
        's1_aux': logits_s1,
        's2_aux': logits_s2,
        'planet_aux': logits_planet,
    }

    criterion = TempoModalLoss(
        main_loss=cross_entropy_mean,
        auxiliary_losses={'s1': cross_entropy_mean,
                          's2': cross_entropy_mean,
                          'planet': cross_entropy_mean},
    )

    out = criterion(forward_dict, labels)
    jax.block_until_ready(out['all'])

    # sanity check against a pure-JAX reference
    def ref_ce(logits, lbl):
        x = jnp.transpose(logits, (0, 2, 3, 1)).reshape(-1, logits.shape[1])
        l = lbl.reshape(-1)
        logp = jax.nn.log_softmax(x, axis=-1)
        return -jnp.mean(jnp.take_along_axis(logp, l[:, None], axis=-1))

    ref_main = ref_ce(logits_main, labels)
    ref_all = ref_main
    for mod, lg in (('s1', logits_s1), ('s2', logits_s2),
                    ('planet', logits_planet)):
        ref_mod = 0.5 * ref_ce(lg, labels)
        assert jnp.allclose(out[mod], ref_mod, rtol=1e-5, atol=1e-5)
        ref_all = ref_all + ref_mod
    assert abs(out['main'] - float(ref_main)) < 1e-5
    assert jnp.allclose(out['all'], ref_all, rtol=1e-5, atol=1e-5)

    print("KERNEL_OK")
</pallas_src>

<mosaic_0001>
module attributes {stable_mosaic.version = 11 : i64} {
  func.func @kernel(%arg0: i32, %arg1: i32, %arg2: i32, %arg3: memref<1x1x256xi32, #tpu.memory_space<vmem>>, %arg4: memref<1x4x256xf32, #tpu.memory_space<vmem>>, %arg5: memref<1x4x256xf32, #tpu.memory_space<vmem>>, %arg6: memref<1x4x256xf32, #tpu.memory_space<vmem>>, %arg7: memref<1x4x256xf32, #tpu.memory_space<vmem>>, %arg8: memref<1x1x5x128xf32, #tpu.memory_space<vmem>>, %arg9: memref<5x256xf32, #tpu.memory_space<vmem>>) attributes {dimension_semantics = [#tpu.dimension_semantics<parallel>, #tpu.dimension_semantics<parallel>, #tpu.dimension_semantics<arbitrary>], iteration_bounds = array<i64: 2, 1, 1>, scalar_prefetch = 0 : i64, scratch_operands = 1 : i64, tpu.core_type = #tpu.core_type<tc>, window_params = [{transform_indices = @transform_0, window_bounds = array<i64: 1, 1, 256>}, {transform_indices = @transform_1, window_bounds = array<i64: 1, 4, 256>}, {transform_indices = @transform_2, window_bounds = array<i64: 1, 4, 256>}, {transform_indices = @transform_3, window_bounds = array<i64: 1, 4, 256>}, {transform_indices = @transform_4, window_bounds = array<i64: 1, 4, 256>}, {transform_indices = @transform_5, window_bounds = array<i64: 1, 1, 5, 128>}]} {
    %c0_i32 = arith.constant 0 : i32
    %0 = arith.cmpi eq, %arg2, %c0_i32 : i32
    %1 = arith.extui %0 : i1 to i32
    %c0_i32_0 = arith.constant 0 : i32
    %2 = arith.cmpi ne, %1, %c0_i32_0 : i32
    scf.if %2 {
      %cst_53 = arith.constant 0.000000e+00 : f32
      %104 = vector.broadcast %cst_53 : f32 to vector<5x256xf32>
      %c0_54 = arith.constant 0 : index
      %c0_55 = arith.constant 0 : index
      %105 = vector.load %arg9[%c0_54, %c0_55] : memref<5x256xf32, #tpu.memory_space<vmem>>, vector<5x256xf32>
      tpu.vector_store %arg9[%c0_54, %c0_55], %104 {strides = array<i32>} : memref<5x256xf32, #tpu.memory_space<vmem>>, vector<5x256xf32>,
    } else {
    }
    %c0 = arith.constant 0 : index
    %c0_1 = arith.constant 0 : index
    %c0_2 = arith.constant 0 : index
    %3 = vector.load %arg3[%c0, %c0_1, %c0_2] : memref<1x1x256xi32, #tpu.memory_space<vmem>>, vector<1x1x256xi32>
    %4 = vector.shape_cast %3 : vector<1x1x256xi32> to vector<1x256xi32>
    %c0_i32_3 = arith.constant 0 : i32
    %5 = vector.broadcast %c0_i32_3 : i32 to vector<1x256xi32>
    %6 = arith.cmpi sge, %4, %5 : vector<1x256xi32>
    %7 = arith.extui %6 : vector<1x256xi1> to vector<1x256xi32>
    %8 = arith.sitofp %7 : vector<1x256xi32> to vector<1x256xf32>
    %9 = tpu.iota {dimensions = array<i32: 0>} : vector<4x256xi32>
    %10 = vector.broadcast %4 : vector<1x256xi32> to vector<4x256xi32>
    %11 = arith.cmpi eq, %9, %10 : vector<4x256xi32>
    %c0_4 = arith.constant 0 : index
    %c0_5 = arith.constant 0 : index
    %c0_6 = arith.constant 0 : index
    %12 = vector.load %arg4[%c0_4, %c0_5, %c0_6] : memref<1x4x256xf32, #tpu.memory_space<vmem>>, vector<1x4x256xf32>
    %13 = vector.shape_cast %12 : vector<1x4x256xf32> to vector<4x256xf32>
    %cst = arith.constant dense<0xFF800000> : vector<256xf32>
    %14 = vector.multi_reduction <maximumf>, %13, %cst [0] : vector<4x256xf32> to vector<256xf32>
    %15 = vector.shape_cast %14 : vector<256xf32> to vector<1x256xf32>
    %16 = vector.broadcast %15 : vector<1x256xf32> to vector<4x256xf32>
    %17 = arith.subf %13, %16 : vector<4x256xf32>
    %18 = math.exp %17 : vector<4x256xf32>
    %cst_7 = arith.constant dense<0.000000e+00> : vector<256xf32>
    %19 = vector.multi_reduction <add>, %18, %cst_7 [0] : vector<4x256xf32> to vector<256xf32>
    %20 = vector.shape_cast %19 : vector<256xf32> to vector<1x256xf32>
    %cst_8 = arith.constant 0.000000e+00 : f32
    %21 = vector.broadcast %cst_8 : f32 to vector<4x256xf32>
    %22 = arith.select %11, %13, %21 : vector<4x256xi1>, vector<4x256xf32>
    %cst_9 = arith.constant dense<0.000000e+00> : vector<256xf32>
    %23 = vector.multi_reduction <add>, %22, %cst_9 [0] : vector<4x256xf32> to vector<256xf32>
    %24 = vector.shape_cast %23 : vector<256xf32> to vector<1x256xf32>
    %25 = arith.subf %15, %24 : vector<1x256xf32>
    %c0_10 = arith.constant 0 : index
    %c0_11 = arith.constant 0 : index
    %c0_12 = arith.constant 0 : index
    %26 = vector.load %arg5[%c0_10, %c0_11, %c0_12] : memref<1x4x256xf32, #tpu.memory_space<vmem>>, vector<1x4x256xf32>
    %27 = vector.shape_cast %26 : vector<1x4x256xf32> to vector<4x256xf32>
    %cst_13 = arith.constant dense<0xFF800000> : vector<256xf32>
    %28 = vector.multi_reduction <maximumf>, %27, %cst_13 [0] : vector<4x256xf32> to vector<256xf32>
    %29 = vector.shape_cast %28 : vector<256xf32> to vector<1x256xf32>
    %30 = vector.broadcast %29 : vector<1x256xf32> to vector<4x256xf32>
    %31 = arith.subf %27, %30 : vector<4x256xf32>
    %32 = math.exp %31 : vector<4x256xf32>
    %cst_14 = arith.constant dense<0.000000e+00> : vector<256xf32>
    %33 = vector.multi_reduction <add>, %32, %cst_14 [0] : vector<4x256xf32> to vector<256xf32>
    %34 = vector.shape_cast %33 : vector<256xf32> to vector<1x256xf32>
    %cst_15 = arith.constant 0.000000e+00 : f32
    %35 = vector.broadcast %cst_15 : f32 to vector<4x256xf32>
    %36 = arith.select %11, %27, %35 : vector<4x256xi1>, vector<4x256xf32>
    %cst_16 = arith.constant dense<0.000000e+00> : vector<256xf32>
    %37 = vector.multi_reduction <add>, %36, %cst_16 [0] : vector<4x256xf32> to vector<256xf32>
    %38 = vector.shape_cast %37 : vector<256xf32> to vector<1x256xf32>
    %39 = arith.subf %29, %38 : vector<1x256xf32>
    %c0_17 = arith.constant 0 : index
    %c0_18 = arith.constant 0 : index
    %c0_19 = arith.constant 0 : index
    %40 = vector.load %arg6[%c0_17, %c0_18, %c0_19] : memref<1x4x256xf32, #tpu.memory_space<vmem>>, vector<1x4x256xf32>
    %41 = vector.shape_cast %40 : vector<1x4x256xf32> to vector<4x256xf32>
    %cst_20 = arith.constant dense<0xFF800000> : vector<256xf32>
    %42 = vector.multi_reduction <maximumf>, %41, %cst_20 [0] : vector<4x256xf32> to vector<256xf32>
    %43 = vector.shape_cast %42 : vector<256xf32> to vector<1x256xf32>
    %44 = vector.broadcast %43 : vector<1x256xf32> to vector<4x256xf32>
    %45 = arith.subf %41, %44 : vector<4x256xf32>
    %46 = math.exp %45 : vector<4x256xf32>
    %cst_21 = arith.constant dense<0.000000e+00> : vector<256xf32>
    %47 = vector.multi_reduction <add>, %46, %cst_21 [0] : vector<4x256xf32> to vector<256xf32>
    %48 = vector.shape_cast %47 : vector<256xf32> to vector<1x256xf32>
    %cst_22 = arith.constant 0.000000e+00 : f32
    %49 = vector.broadcast %cst_22 : f32 to vector<4x256xf32>
    %50 = arith.select %11, %41, %49 : vector<4x256xi1>, vector<4x256xf32>
    %cst_23 = arith.constant dense<0.000000e+00> : vector<256xf32>
    %51 = vector.multi_reduction <add>, %50, %cst_23 [0] : vector<4x256xf32> to vector<256xf32>
    %52 = vector.shape_cast %51 : vector<256xf32> to vector<1x256xf32>
    %53 = arith.subf %43, %52 : vector<1x256xf32>
    %c0_24 = arith.constant 0 : index
    %c0_25 = arith.constant 0 : index
    %c0_26 = arith.constant 0 : index
    %54 = vector.load %arg7[%c0_24, %c0_25, %c0_26] : memref<1x4x256xf32, #tpu.memory_space<vmem>>, vector<1x4x256xf32>
    %55 = vector.shape_cast %54 : vector<1x4x256xf32> to vector<4x256xf32>
    %cst_27 = arith.constant dense<0xFF800000> : vector<256xf32>
    %56 = vector.multi_reduction <maximumf>, %55, %cst_27 [0] : vector<4x256xf32> to vector<256xf32>
    %57 = vector.shape_cast %56 : vector<256xf32> to vector<1x256xf32>
    %58 = vector.broadcast %57 : vector<1x256xf32> to vector<4x256xf32>
    %59 = arith.subf %55, %58 : vector<4x256xf32>
    %60 = math.exp %59 : vector<4x256xf32>
    %cst_28 = arith.constant dense<0.000000e+00> : vector<256xf32>
    %61 = vector.multi_reduction <add>, %60, %cst_28 [0] : vector<4x256xf32> to vector<256xf32>
    %62 = vector.shape_cast %61 : vector<256xf32> to vector<1x256xf32>
    %cst_29 = arith.constant 0.000000e+00 : f32
    %63 = vector.broadcast %cst_29 : f32 to vector<4x256xf32>
    %64 = arith.select %11, %55, %63 : vector<4x256xi1>, vector<4x256xf32>
    %cst_30 = arith.constant dense<0.000000e+00> : vector<256xf32>
    %65 = vector.multi_reduction <add>, %64, %cst_30 [0] : vector<4x256xf32> to vector<256xf32>
    %66 = vector.shape_cast %65 : vector<256xf32> to vector<1x256xf32>
    %67 = arith.subf %57, %66 : vector<1x256xf32>
    %68 = tpu.concatenate %20, %34, %48, %62 in 0 : vector<1x256xf32>, vector<1x256xf32>, vector<1x256xf32>, vector<1x256xf32> -> vector<4x256xf32>
    %69 = math.log %68 : vector<4x256xf32>
    %70 = vector.extract_strided_slice %69 {offsets = [0, 0], sizes = [1, 256], strides = [1, 1]} : vector<4x256xf32> to vector<1x256xf32>
    %71 = arith.addf %70, %25 : vector<1x256xf32>
    %c0_31 = arith.constant 0 : index
    %c0_32 = arith.constant 0 : index
    %72 = vector.load %arg9[%c0_31, %c0_32] : memref<5x256xf32, #tpu.memory_space<vmem>>, vector<1x256xf32>
    %cst_33 = arith.constant 0.000000e+00 : f32
    %73 = vector.broadcast %cst_33 : f32 to vector<1x256xf32>
    %74 = arith.select %6, %71, %73 : vector<1x256xi1>, vector<1x256xf32>
    %75 = arith.addf %72, %74 : vector<1x256xf32>
    %c0_34 = arith.constant 0 : index
    %c0_35 = arith.constant 0 : index
    %76 = vector.load %arg9[%c0_34, %c0_35] : memref<5x256xf32, #tpu.memory_space<vmem>>, vector<1x256xf32>
    tpu.vector_store %arg9[%c0_34, %c0_35], %75 {strides = array<i32>} : memref<5x256xf32, #tpu.memory_space<vmem>>, vector<1x256xf32>,
    %77 = vector.extract_strided_slice %69 {offsets = [1, 0], sizes = [1, 256], strides = [1, 1]} : vector<4x256xf32> to vector<1x256xf32>
    %78 = arith.addf %77, %39 : vector<1x256xf32>
    %c1 = arith.constant 1 : index
    %c0_36 = arith.constant 0 : index
    %79 = vector.load %arg9[%c1, %c0_36] : memref<5x256xf32, #tpu.memory_space<vmem>>, vector<1x256xf32>
    %cst_37 = arith.constant 0.000000e+00 : f32
    %80 = vector.broadcast %cst_37 : f32 to vector<1x256xf32>
    %81 = arith.select %6, %78, %80 : vector<1x256xi1>, vector<1x256xf32>
    %82 = arith.addf %79, %81 : vector<1x256xf32>
    %c1_38 = arith.constant 1 : index
    %c0_39 = arith.constant 0 : index
    %83 = vector.load %arg9[%c1_38, %c0_39] : memref<5x256xf32, #tpu.memory_space<vmem>>, vector<1x256xf32>
    tpu.vector_store %arg9[%c1_38, %c0_39], %82 {strides = array<i32>} : memref<5x256xf32, #tpu.memory_space<vmem>>, vector<1x256xf32>,
    %84 = vector.extract_strided_slice %69 {offsets = [2, 0], sizes = [1, 256], strides = [1, 1]} : vector<4x256xf32> to vector<1x256xf32>
    %85 = arith.addf %84, %53 : vector<1x256xf32>
    %c2 = arith.constant 2 : index
    %c0_40 = arith.constant 0 : index
    %86 = vector.load %arg9[%c2, %c0_40] : memref<5x256xf32, #tpu.memory_space<vmem>>, vector<1x256xf32>
    %cst_41 = arith.constant 0.000000e+00 : f32
    %87 = vector.broadcast %cst_41 : f32 to vector<1x256xf32>
    %88 = arith.select %6, %85, %87 : vector<1x256xi1>, vector<1x256xf32>
    %89 = arith.addf %86, %88 : vector<1x256xf32>
    %c2_42 = arith.constant 2 : index
    %c0_43 = arith.constant 0 : index
    %90 = vector.load %arg9[%c2_42, %c0_43] : memref<5x256xf32, #tpu.memory_space<vmem>>, vector<1x256xf32>
    tpu.vector_store %arg9[%c2_42, %c0_43], %89 {strides = array<i32>} : memref<5x256xf32, #tpu.memory_space<vmem>>, vector<1x256xf32>,
    %91 = vector.extract_strided_slice %69 {offsets = [3, 0], sizes = [1, 256], strides = [1, 1]} : vector<4x256xf32> to vector<1x256xf32>
    %92 = arith.addf %91, %67 : vector<1x256xf32>
    %c3 = arith.constant 3 : index
    %c0_44 = arith.constant 0 : index
    %93 = vector.load %arg9[%c3, %c0_44] : memref<5x256xf32, #tpu.memory_space<vmem>>, vector<1x256xf32>
    %cst_45 = arith.constant 0.000000e+00 : f32
    %94 = vector.broadcast %cst_45 : f32 to vector<1x256xf32>
    %95 = arith.select %6, %92, %94 : vector<1x256xi1>, vector<1x256xf32>
    %96 = arith.addf %93, %95 : vector<1x256xf32>
    %c3_46 = arith.constant 3 : index
    %c0_47 = arith.constant 0 : index
    %97 = vector.load %arg9[%c3_46, %c0_47] : memref<5x256xf32, #tpu.memory_space<vmem>>, vector<1x256xf32>
    tpu.vector_store %arg9[%c3_46, %c0_47], %96 {strides = array<i32>} : memref<5x256xf32, #tpu.memory_space<vmem>>, vector<1x256xf32>,
    %c4 = arith.constant 4 : index
    %c0_48 = arith.constant 0 : index
    %98 = vector.load %arg9[%c4, %c0_48] : memref<5x256xf32, #tpu.memory_space<vmem>>, vector<1x256xf32>
    %99 = arith.addf %98, %8 : vector<1x256xf32>
    %c4_49 = arith.constant 4 : index
    %c0_50 = arith.constant 0 : index
    %100 = vector.load %arg9[%c4_49, %c0_50] : memref<5x256xf32, #tpu.memory_space<vmem>>, vector<1x256xf32>
    tpu.vector_store %arg9[%c4_49, %c0_50], %99 {strides = array<i32>} : memref<5x256xf32, #tpu.memory_space<vmem>>, vector<1x256xf32>,
    %c0_i32_51 = arith.constant 0 : i32
    %101 = arith.cmpi eq, %arg2, %c0_i32_51 : i32
    %102 = arith.extui %101 : i1 to i32
    %c0_i32_52 = arith.constant 0 : i32
    %103 = arith.cmpi ne, %102, %c0_i32_52 : i32
    scf.if %103 {
      %c0_53 = arith.constant 0 : index
      %c0_54 = arith.constant 0 : index
      %104 = vector.load %arg9[%c0_53, %c0_54] : memref<5x256xf32, #tpu.memory_space<vmem>>, vector<5x128xf32>
      %c0_55 = arith.constant 0 : index
      %c128 = arith.constant 128 : index
      %105 = vector.load %arg9[%c0_55, %c128] : memref<5x256xf32, #tpu.memory_space<vmem>>, vector<5x128xf32>
      %106 = arith.addf %104, %105 : vector<5x128xf32>
      %107 = vector.shape_cast %106 : vector<5x128xf32> to vector<1x1x5x128xf32>
      %c0_56 = arith.constant 0 : index
      %c0_57 = arith.constant 0 : index
      %c0_58 = arith.constant 0 : index
      %c0_59 = arith.constant 0 : index
      %108 = vector.load %arg8[%c0_56, %c0_57, %c0_58, %c0_59] : memref<1x1x5x128xf32, #tpu.memory_space<vmem>>, vector<1x1x5x128xf32>
      tpu.vector_store %arg8[%c0_56, %c0_57, %c0_58, %c0_59], %107 {strides = array<i32>} : memref<1x1x5x128xf32, #tpu.memory_space<vmem>>, vector<1x1x5x128xf32>,
    } else {
    }
    return
  }
  func.func @transform_0(%arg0: i32, %arg1: i32, %arg2: i32) -> (i32, i32, i32) {
    %c1_i32 = arith.constant 1 : i32
    %0 = arith.muli %arg1, %c1_i32 : i32
    %1 = arith.addi %0, %arg2 : i32
    %c0_i32 = arith.constant 0 : i32
    %c0_i32_0 = arith.constant 0 : i32
    return %arg0, %c0_i32, %1 : i32, i32, i32
  }
  func.func @transform_1(%arg0: i32, %arg1: i32, %arg2: i32) -> (i32, i32, i32) {
    %c1_i32 = arith.constant 1 : i32
    %0 = arith.muli %arg1, %c1_i32 : i32
    %1 = arith.addi %0, %arg2 : i32
    %c0_i32 = arith.constant 0 : i32
    %c0_i32_0 = arith.constant 0 : i32
    return %arg0, %c0_i32, %1 : i32, i32, i32
  }
  func.func @transform_2(%arg0: i32, %arg1: i32, %arg2: i32) -> (i32, i32, i32) {
    %c1_i32 = arith.constant 1 : i32
    %0 = arith.muli %arg1, %c1_i32 : i32
    %1 = arith.addi %0, %arg2 : i32
    %c0_i32 = arith.constant 0 : i32
    %c0_i32_0 = arith.constant 0 : i32
    return %arg0, %c0_i32, %1 : i32, i32, i32
  }
  func.func @transform_3(%arg0: i32, %arg1: i32, %arg2: i32) -> (i32, i32, i32) {
    %c1_i32 = arith.constant 1 : i32
    %0 = arith.muli %arg1, %c1_i32 : i32
    %1 = arith.addi %0, %arg2 : i32
    %c0_i32 = arith.constant 0 : i32
    %c0_i32_0 = arith.constant 0 : i32
    return %arg0, %c0_i32, %1 : i32, i32, i32
  }
  func.func @transform_4(%arg0: i32, %arg1: i32, %arg2: i32) -> (i32, i32, i32) {
    %c1_i32 = arith.constant 1 : i32
    %0 = arith.muli %arg1, %c1_i32 : i32
    %1 = arith.addi %0, %arg2 : i32
    %c0_i32 = arith.constant 0 : i32
    %c0_i32_0 = arith.constant 0 : i32
    return %arg0, %c0_i32, %1 : i32, i32, i32
  }
  func.func @transform_5(%arg0: i32, %arg1: i32, %arg2: i32) -> (i32, i32, i32, i32) {
    %c0_i32 = arith.constant 0 : i32
    %c0_i32_0 = arith.constant 0 : i32
    %c0_i32_1 = arith.constant 0 : i32
    return %arg0, %arg1, %c0_i32, %c0_i32_0 : i32, i32, i32, i32
  }
}

</mosaic_0001>

<bundles_post_ra>
// kernel: multi_cross_entropy_mean.1
= control target key start
LH: loop header
LB: loop body
LE: loop exit
PB: predicated region body
PF: predicated region fallthrough
CT: control target
= control target key end

     0   :  { %s1110_s18 = smov 0   ;;  %s1112_s19 = smov 0   ;;  %s1351_s0 = inlined_call_operand.vmem [shape: s32[2,1,256], index: 0, kind: input, shape index: {}]   ;;  %s1352_s1 = inlined_call_operand.vmem [shape: f32[2,4,256], index: 1, kind: input, shape index: {}]   ;;  %s1353_s2 = inlined_call_operand.vmem [shape: f32[2,4,256], index: 2, kind: input, shape index: {}]   ;;  %s1354_s3 = inlined_call_operand.vmem [shape: f32[2,4,256], index: 3, kind: input, shape index: {}]   ;;  %s1355_s4 = inlined_call_operand.vmem [shape: f32[2,4,256], index: 4, kind: input, shape index: {}]   ;;  %s1356_s5 = inlined_call_operand.vmem [shape: f32[2,1,5,128], index: 5, kind: output, shape index: {}]  }
   0x1   :  { %s1114_s20 = smov 0  }
   0x2 LB: > { %s34_s21 = sadd.s32 1, %s1072_s19  ;;  %p994_p0 = scmp.ge.s32.totalorder %s1076_s20, 1  ;;  %s1076_s20 = sphi %s1114_s20, %s15_s20   ;;  %s1072_s19 = sphi %s1112_s19, %s1360_s19   ;;  %s1068_s18 = sphi %s1110_s18, %s1359_s18  }
   0x3   : > { %p36_p1 = scmp.ge.s32.totalorder %s34_s21, 2  ;;  %p302_p2 = scmp.lt.s32.totalorder %s1076_s20, 3 }
   0x5   : > { %s1362_s21 = smov (%p36_p1, %s34_s21), 0  ;;  %p303_p3 = pnand %p994_p0, %p302_p2 }
   0x6   : > { %p378_p4 = scmp.lt.s32.totalorder (!%p303_p3), %s1068_s18, 1  ;;  %v452_v0 = vlaneseq (!%p303_p3)  ;;  %v1078_v1 = vmov (!%p303_p3), 0.0   ;;  %vm468_vm0 = vcmask (!%p303_p3), 1043456   ;;  %vm705_vm5 = vcmask (!%p303_p3), 1040384  }
   0x7   : > { %306 = sbr.rel (%p303_p3) target bundleno = 114 (0x72), region = 40  ;;  %446 = vst [vmem:[#allocation2] sm:$0x1f] (!%p303_p3), %v1078_v1  ;;  %447 = vst [vmem:[#allocation2 + $0x8] sm:$0x1f] (!%p303_p3), %v1078_v1  ;;  %vm708_vm6 = vcmask (!%p303_p3), 1041408  }
   0x8   : > { %v1131_v2 = vshrl.u32 (!%p303_p3), %v452_v0, 7  ;;  %vm1278_vm4 = vcmp.lt.s32.totalorder (!%p303_p3), %v452_v0, 256  ;;  %vm711_vm7 = vcmask (!%p303_p3), 1042432  }
   0xa   : > { %v456_v3 = vsub.s32 (!%p303_p3), 0, %v1131_v2  ;;  %v460_v7 = vsub.s32 (!%p303_p3), 1, %v1131_v2 }
   0xe   : > { %s1364_s18 = smov (!%p378_p4, %s1068_s18), 1 }
   0xf   : > { %s995_s22 = sshll.u32 %s1364_s18, 1  ;;  %s1133_s23 = sshll.u32 %s1364_s18, 3 }
  0x10   : > { %s384_s26 = scalar_lea.vmem %s1351_s0, %s995_s22  ;;  %s396_s29 = scalar_lea.vmem %s1352_s1, %s1133_s23 }
  0x11   : > { %s408_s7 = scalar_lea.vmem %s1353_s2, %s1133_s23  ;;  %s420_s10 = scalar_lea.vmem %s1354_s3, %s1133_s23  ;;  %v1151_v4 = vld [vmem:[%s384_s26] sm:$0x3] }
  0x12   : > { %s432_s13 = scalar_lea.vmem %s1355_s4, %s1133_s23  ;;  %v1157_v5 = vld [vmem:[%s408_s7] sm:$0xff]  ;;  %v1175_v12 = vrot.slane %v1151_v4, %v456_v3  ;;  %v1196_v33 = vrot.slane %v1151_v4, %v460_v7  ;;  %vm449_vm3 = vcmp.ge.s32.totalorder %v1151_v4, 0  ;;  %s441_s16 = scalar_lea.vmem %s1356_s5, %s1133_s23 }
  0x13   : > { %v1159_v6 = vld [vmem:[%s420_s10] sm:$0xff]  ;;  %v1164_v8 = vcombine.high %v1157_v5, %v1157_v5  ;;  %v529_v9 = vsel %vm468_vm0, %v1157_v5, -inf }
  0x14   : > { %v1170_v10 = vcombine.high %v1159_v6, %v1159_v6  ;;  %v1172_v11 = vld [vmem:[%s432_s13] sm:$0xff]  ;;  %v530_v14 = vrot.slane %v529_v9, 4  ;;  %v589_v15 = vsel %vm468_vm0, %v1159_v6, -inf  ;;  %vm462_vm1 = vcmp.eq.s32.totalorder %v1131_v2, %v1175_v12 }
  0x15   : > { %v1177_v13 = vld [vmem:[%s396_s29] sm:$0xff]  ;;  %v1183_v16 = vcombine.high %v1172_v11, %v1172_v11  ;;  %v649_v17 = vsel %vm468_vm0, %v1172_v11, -inf  ;;  %v536_v18 = vsel %vm468_vm0, %v1164_v8, -inf  ;;  %v590_v19 = vrot.slane %v589_v15, 4 }
  0x16   : > { %v596_v20 = vsel %vm468_vm0, %v1170_v10, -inf  ;;  %v650_v21 = vrot.slane %v649_v17, 4  ;;  %v531_v22 = vmax.f32 %v529_v9, %v530_v14  ;;  %v537_v23 = vrot.slane %v536_v18, 4 }
  0x17   : > { %v597_v24 = vrot.slane %v596_v20, 4  ;;  %v656_v25 = vsel %vm468_vm0, %v1183_v16, -inf  ;;  %v591_v26 = vmax.f32 %v589_v15, %v590_v19  ;;  %v466_v29 = vcombine.high %v1177_v13, %v1177_v13 }
  0x18   : > { %v651_v27 = vmax.f32 %v649_v17, %v650_v21  ;;  %v657_v28 = vrot.slane %v656_v25, 4  ;;  %v532_v30 = vrot.slane %v531_v22, 2  ;;  %v538_v31 = vmax.f32 %v536_v18, %v537_v23 }
  0x19   : > { %v598_v32 = vmax.f32 %v596_v20, %v597_v24  ;;  %v592_v34 = vrot.slane %v591_v26, 2  ;;  %v469_v37 = vsel %vm468_vm0, %v1177_v13, -inf  ;;  %v476_v45 = vsel %vm468_vm0, %v466_v29, -inf }
  0x1a   : > { %v652_v35 = vrot.slane %v651_v27, 2  ;;  %v658_v36 = vmax.f32 %v656_v25, %v657_v28  ;;  %v533_v38 = vmax.f32 %v531_v22, %v532_v30  ;;  %v539_v39 = vrot.slane %v538_v31, 2 }
  0x1b   : > { %v599_v40 = vrot.slane %v598_v32, 2  ;;  %v470_v41 = vrot.slane %v469_v37, 4  ;;  %v593_v42 = vmax.f32 %v591_v26, %v592_v34  ;;  %v477_v53 = vrot.slane %v476_v45, 4 }
  0x1c   : > { %v653_v43 = vmax.f32 %v651_v27, %v652_v35  ;;  %v659_v44 = vrot.slane %v658_v36, 2  ;;  %v534_v46 = vrot.slane %v533_v38, 1  ;;  %v540_v47 = vmax.f32 %v538_v31, %v539_v39 }
  0x1d   : > { %v600_v48 = vmax.f32 %v598_v32, %v599_v40  ;;  %v471_v49 = vmax.f32 %v469_v37, %v470_v41  ;;  %v594_v50 = vrot.slane %v593_v42, 1  ;;  %v478_v61 = vmax.f32 %v476_v45, %v477_v53  ;;  %v830_v45 = vld [vmem:[#allocation2 + $0x4] ss:$8 sm:$0x3] }
  0x1e   : > { %v654_v51 = vrot.slane %v653_v43, 1  ;;  %v660_v52 = vmax.f32 %v658_v36, %v659_v44  ;;  %v1201_v54 = vmax.f32 %v533_v38, %v534_v46  ;;  %v541_v55 = vrot.slane %v540_v47, 1 }
  0x1f   : > { %v601_v56 = vrot.slane %v600_v48, 1  ;;  %v472_v57 = vrot.slane %v471_v49, 2  ;;  %v1203_v58 = vmax.f32 %v593_v42, %v594_v50  ;;  %v479_v9 = vrot.slane %v478_v61, 2 }
  0x20   : > { %v1205_v59 = vmax.f32 %v653_v43, %v654_v51  ;;  %v661_v60 = vrot.slane %v660_v52, 1  ;;  %v1207_v62 = vmax.f32 %v540_v47, %v541_v55  ;;  %vm463_vm2 = vcmp.eq.s32.totalorder %v1131_v2, %v1196_v33 }
  0x21   : > { %v1209_v63 = vmax.f32 %v600_v48, %v601_v56  ;;  %v473_v3 = vmax.f32 %v471_v49, %v472_v57  ;;  %v480_v19 = vmax.f32 %v478_v61, %v479_v9  ;;  %v507_v20 = vsel %vm462_vm1, %v1177_v13, 0.0 }
  0x22   : > { %v1211_v7 = vmax.f32 %v660_v52, %v661_v60  ;;  %v545_v14 = vcombine.low %v1201_v54, %v1207_v62  ;;  %v508_v23 = vsel %vm463_vm2, %v466_v29, 0.0  ;;  %v509_v30 = vsel %vm468_vm0, %v507_v20, 0.0 }
  0x23   : > { %v605_v15 = vcombine.low %v1203_v58, %v1209_v63  ;;  %v474_v17 = vrot.slane %v473_v3, 1  ;;  %v481_v26 = vrot.slane %v480_v19, 1  ;;  %v516_v34 = vsel %vm468_vm0, %v508_v23, 0.0 }
  0x24   : > { %v665_v18 = vcombine.low %v1205_v59, %v1211_v7  ;;  %v547_v21 = vsub.f32 %v1157_v5, %v545_v14  ;;  %v567_v29 = vsel %vm462_vm1, %v1157_v5, 0.0  ;;  %v510_v36 = vrot.slane %v509_v30, 4 }
  0x25   : > { %v607_v22 = vsub.f32 %v1159_v6, %v605_v15  ;;  %v1233_v25 = vmax.f32 %v473_v3, %v474_v17  ;;  %v1236_v32 = vmax.f32 %v480_v19, %v481_v26  ;;  %v517_v37 = vrot.slane %v516_v34, 4 }
  0x26   : > { %v667_v24 = vsub.f32 %v1172_v11, %v665_v18  ;;  %v548_v27 = vmul.f32 1.442695, %v547_v21  ;;  %v569_v39 = vsel %vm468_vm0, %v567_v29, 0.0  ;;  %v568_v40 = vsel %vm463_vm2, %v1164_v8, 0.0 }
  0x27   : > { %v608_v28 = vmul.f32 1.442695, %v607_v22  ;;  %v485_v35 = vcombine.low %v1233_v25, %v1236_v32  ;;  %v1252_v5 = vadd.f32 %v510_v36, %v509_v30  ;;  %v1254_v42 = vadd.f32 %v517_v37, %v516_v34 }
  0x28   : > { %v668_v31 = vmul.f32 1.442695, %v667_v24  ;;  %1042 = vpow2.f32 %v548_v27  ;;  %v570_v43 = vrot.slane %v569_v39, 4  ;;  %v1005_v44 = vsel %vm449_vm3, 1.0, %v1078_v1 }
  0x29   : > { %1044 = vpow2.f32 %v608_v28  ;;  %v487_v38 = vsub.f32 %v1177_v13, %v485_v35  ;;  %v576_v13 = vsel %vm468_vm0, %v568_v40, 0.0  ;;  %v627_v46 = vsel %vm462_vm1, %v1159_v6, 0.0 }
  0x2a   : > { %1046 = vpow2.f32 %v668_v31  ;;  %v628_v8 = vsel %vm463_vm2, %v1170_v10, 0.0  ;;  %v512_v47 = vrot.slane %v1252_v5, 2  ;;  %v687_v1 = vsel %vm462_vm1, %v1172_v11, 0.0 }
  0x2b   : > { %v488_v41 = vmul.f32 1.442695, %v487_v38  ;;  %v688_v48 = vsel %vm463_vm2, %v1183_v16, 0.0  ;;  %v519_v10 = vrot.slane %v1254_v42, 2  ;;  %v1283_v50 = vadd.f32 %v570_v43, %v569_v39 }
  0x2c   : > { %v577_v51 = vrot.slane %v576_v13, 4  ;;  %v831_v52 = vadd.f32 %v1005_v44, %v830_v45  ;;  %v629_v55 = vsel %vm468_vm0, %v627_v46, 0.0  ;;  %v636_v16 = vsel %vm468_vm0, %v628_v8, 0.0 }
  0x2d   : > { %1048 = vpow2.f32 %v488_v41  ;;  %v689_v60 = vsel %vm468_vm0, %v687_v1, 0.0  ;;  %v630_v23 = vrot.slane %v629_v55, 4  ;;  %v637_v29 = vrot.slane %v636_v16, 4 }
  0x2e   : > { %832 = vst.msk [vmem:[#allocation2 + $0x4] ss:$8 sm:$0x3] %vm1278_vm4, %v831_v52  ;;  %v690_v35 = vrot.slane %v689_v60, 4  ;;  %v696_v44 = vsel %vm468_vm0, %v688_v48, 0.0 }
  0x32   : > { %v1043_v49 = vpop.eup %1042 }
  0x33   : > { %v1045_v53 = vpop.eup %1044  ;;  %v551_v12 = vcombine.high %v1043_v49, %v1043_v49  ;;  %v553_v11 = vsel %vm468_vm0, %v1043_v49, 0.0 }
  0x34   : > { %v1047_v33 = vpop.eup %1046  ;;  %v554_v0 = vrot.slane %v553_v11, 4  ;;  %v611_v56 = vcombine.high %v1045_v53, %v1045_v53  ;;  %v613_v57 = vsel %vm468_vm0, %v1045_v53, 0.0  ;;  %v578_v53 = vadd.f32 %v577_v51, %v576_v13 }
  0x35   : > { %v560_v61 = vsel %vm468_vm0, %v551_v12, 0.0  ;;  %v614_v3 = vrot.slane %v613_v57, 4  ;;  %v671_v9 = vcombine.high %v1047_v33, %v1047_v33  ;;  %v673_v14 = vsel %vm468_vm0, %v1047_v33, 0.0 }
  0x36   : > { %v555_v15 = vadd.f32 %v554_v0, %v553_v11  ;;  %v561_v17 = vrot.slane %v560_v61, 4  ;;  %v620_v18 = vsel %vm468_vm0, %v611_v56, 0.0  ;;  %v674_v19 = vrot.slane %v673_v14, 4 }
  0x37   : > { %v615_v20 = vadd.f32 %v614_v3, %v613_v57  ;;  %v621_v21 = vrot.slane %v620_v18, 4  ;;  %v680_v22 = vsel %vm468_vm0, %v671_v9, 0.0  ;;  %v1049_v30 = vpop.eup %1048  ;;  %v631_v12 = vadd.f32 %v630_v23, %v629_v55 }
  0x38   : > { %v556_v24 = vrot.slane %v555_v15, 2  ;;  %v562_v26 = vadd.f32 %v561_v17, %v560_v61  ;;  %v675_v27 = vadd.f32 %v674_v19, %v673_v14  ;;  %v681_v28 = vrot.slane %v680_v22, 4 }
  0x39   : > { %v616_v31 = vrot.slane %v615_v20, 2  ;;  %v622_v34 = vadd.f32 %v621_v21, %v620_v18  ;;  %v491_v36 = vcombine.high %v1049_v30, %v1049_v30  ;;  %v493_v37 = vsel %vm468_vm0, %v1049_v30, 0.0 }
  0x3a   : > { %v557_v38 = vadd.f32 %v556_v24, %v555_v15  ;;  %v563_v39 = vrot.slane %v562_v26, 2  ;;  %v494_v40 = vrot.slane %v493_v37, 4  ;;  %v676_v43 = vrot.slane %v675_v27, 2 }
  0x3b   : > { %v623_v41 = vrot.slane %v622_v34, 2  ;;  %v500_v45 = vsel %vm468_vm0, %v491_v36, 0.0  ;;  %v617_v8 = vadd.f32 %v616_v31, %v615_v20  ;;  %v682_v1 = vadd.f32 %v681_v28, %v680_v22 }
  0x3c   : > { %v564_v46 = vadd.f32 %v563_v39, %v562_v26  ;;  %v495_v49 = vadd.f32 %v494_v40, %v493_v37  ;;  %v501_v52 = vrot.slane %v500_v45, 4  ;;  %v558_v11 = vrot.slane %v557_v38, 1 }
  0x3d   : > { %v624_v33 = vadd.f32 %v623_v41, %v622_v34  ;;  %v677_v0 = vadd.f32 %v676_v43, %v675_v27  ;;  %v683_v56 = vrot.slane %v682_v1, 2  ;;  %v638_v3 = vadd.f32 %v637_v29, %v636_v16 }
  0x3e   : > { %v496_v57 = vrot.slane %v495_v49, 2  ;;  %v502_v61 = vadd.f32 %v501_v52, %v500_v45  ;;  %v697_v9 = vrot.slane %v696_v44, 4  ;;  %v565_v48 = vrot.slane %v564_v46, 1 }
  0x3f   : > { %v618_v14 = vrot.slane %v617_v8, 1  ;;  %v684_v15 = vadd.f32 %v683_v56, %v682_v1  ;;  %v691_v17 = vadd.f32 %v690_v35, %v689_v60  ;;  %v678_v20 = vrot.slane %v677_v0, 1 }
  0x40   : > { %v497_v18 = vadd.f32 %v496_v57, %v495_v49  ;;  %v503_v19 = vrot.slane %v502_v61, 2  ;;  %v572_v21 = vrot.slane %v1283_v50, 2  ;;  %v559_v22 = vadd.f32 %v558_v11, %v557_v38 }
  0x41   : > { %v625_v13 = vrot.slane %v624_v33, 1  ;;  %v579_v51 = vrot.slane %v578_v53, 2  ;;  %v632_v55 = vrot.slane %v631_v12, 2  ;;  %v685_v26 = vrot.slane %v684_v15, 1 }
  0x42   : > { %v498_v23 = vrot.slane %v497_v18, 1  ;;  %v504_v24 = vadd.f32 %v503_v19, %v502_v61  ;;  %v698_v27 = vadd.f32 %v697_v9, %v696_v44  ;;  %v566_v28 = vadd.f32 %v565_v48, %v564_v46 }
  0x43   : > { %v619_v16 = vadd.f32 %v618_v14, %v617_v8  ;;  %v639_v30 = vrot.slane %v638_v3, 2  ;;  %v692_v31 = vrot.slane %v691_v17, 2  ;;  %v679_v60 = vadd.f32 %v678_v20, %v677_v0 }
  0x44   : > { %v499_v34 = vadd.f32 %v498_v23, %v497_v18  ;;  %v505_v29 = vrot.slane %v504_v24, 1  ;;  %v699_v35 = vrot.slane %v698_v27, 2  ;;  %v513_v36 = vadd.f32 %v512_v47, %v1252_v5 }
  0x45   : > { %v626_v37 = vadd.f32 %v625_v13, %v624_v33  ;;  %v573_v38 = vadd.f32 %v572_v21, %v1283_v50  ;;  %v686_v40 = vadd.f32 %v685_v26, %v684_v15  ;;  %v633_v43 = vadd.f32 %v632_v55, %v631_v12 }
  0x46   : > { %v506_v39 = vadd.f32 %v505_v29, %v504_v24  ;;  %v706_v41 = vsel %vm705_vm5, %v499_v34, %v559_v22  ;;  %v520_v44 = vadd.f32 %v519_v10, %v1254_v42  ;;  %v580_v46 = vadd.f32 %v579_v51, %v578_v53 }
  0x47   : > { %v709_v45 = vsel %vm708_vm6, %v706_v41, %v619_v16  ;;  %v693_v8 = vadd.f32 %v692_v31, %v691_v17  ;;  %v640_v47 = vadd.f32 %v639_v30, %v638_v3  ;;  %v700_v49 = vadd.f32 %v699_v35, %v698_v27 }
  0x48   : > { %v707_v1 = vsel %vm705_vm5, %v506_v39, %v566_v28  ;;  %v712_v5 = vsel %vm711_vm7, %v709_v45, %v679_v60  ;;  %v514_v52 = vrot.slane %v513_v36, 1  ;;  %v574_v11 = vrot.slane %v573_v38, 1 }
  0x49   : > { %v710_v50 = vsel %vm708_vm6, %v707_v1, %v626_v37  ;;  %1050 = vlog2.f32 %v712_v5  ;;  %v634_v33 = vrot.slane %v633_v43, 1  ;;  %v521_v0 = vrot.slane %v520_v44, 1  ;;  %v777_v1 = vld [vmem:[#allocation2 + $0x2] ss:$8 sm:$0x3] }
  0x4a   : > { %v713_v12 = vsel %vm711_vm7, %v710_v50, %v686_v40  ;;  %v694_v42 = vrot.slane %v693_v8, 1  ;;  %v581_v10 = vrot.slane %v580_v46, 1  ;;  %v641_v53 = vrot.slane %v640_v47, 1  ;;  %v720_v40 = vld [vmem:[#allocation2] ss:$8 sm:$0x3] }
  0x4b   : > { %1052 = vlog2.f32 %v713_v12  ;;  %v701_v56 = vrot.slane %v700_v49, 1  ;;  %v515_v57 = vadd.f32 %v514_v52, %v513_v36  ;;  %v575_v61 = vadd.f32 %v574_v11, %v573_v38  ;;  %v804_v12 = vld [vmem:[#allocation2 + $0x3] ss:$8 sm:$0x3] }
  0x4c   : > { %v635_v9 = vadd.f32 %v634_v33, %v633_v43  ;;  %v522_v48 = vadd.f32 %v521_v0, %v520_v44  ;;  %v1079_v3 = vmov 1966171168   ;;  %v695_v15 = vadd.f32 %v694_v42, %v693_v8 }
  0x4d   : > { %v725_v14 = vunpack.c.l.s4 %v1079_v3  ;;  %v582_v17 = vadd.f32 %v581_v10, %v580_v46  ;;  %v642_v18 = vadd.f32 %v641_v53, %v640_v47  ;;  %v702_v19 = vadd.f32 %v701_v56, %v700_v49  ;;  %v750_v46 = vld [vmem:[#allocation2 + $0x1] ss:$8 sm:$0x3] }
  0x4e   : > { %v523_v20 = vsub.f32 %v1233_v25, %v515_v57  ;;  %v583_v21 = vsub.f32 %v1201_v54, %v575_v61  ;;  %v643_v22 = vsub.f32 %v1203_v58, %v635_v9  ;;  %v524_v51 = vsub.f32 %v1236_v32, %v522_v48 }
  0x4f   : > { %v726_v55 = vunpack.c.0.s8 %v725_v14  ;;  %v703_v23 = vsub.f32 %v1205_v59, %v695_v15  ;;  %v584_v26 = vsub.f32 %v1207_v62, %v582_v17  ;;  %v644_v27 = vsub.f32 %v1209_v63, %v642_v18 }
  0x50   : > { %v704_v28 = vsub.f32 %v1211_v7, %v702_v19 }
  0x51   : > { %v729_v58 = vsub.s32 %v726_v55, %v1131_v2 }
  0x53   : > { %v1051_v13 = vpop.eup %1050 }
  0x54   : > { %v715_v24 = vmul.f32 0.6931472, %v1051_v13 }
  0x55   : > { %v1053_v16 = vpop.eup %1052 }
  0x56   : > { %v717_v30 = vmul.f32 0.6931472, %v1053_v16  ;;  %v718_v25 = vadd.f32 %v715_v24, %v523_v20  ;;  %v747_v31 = vadd.f32 %v715_v24, %v583_v21  ;;  %v774_v54 = vadd.f32 %v715_v24, %v643_v22 }
  0x57   : > { %v801_v34 = vadd.f32 %v715_v24, %v703_v23 }
  0x58   : > { %v719_v29 = vadd.f32 %v717_v30, %v524_v51  ;;  %v748_v32 = vadd.f32 %v717_v30, %v584_v26  ;;  %v775_v60 = vadd.f32 %v717_v30, %v644_v27  ;;  %v802_v35 = vadd.f32 %v717_v30, %v704_v28 }
  0x5a   : > { %v723_v59 = vcombine.low %v718_v25, %v719_v29  ;;  %v753_v36 = vcombine.low %v747_v31, %v748_v32  ;;  %v780_v37 = vcombine.low %v774_v54, %v775_v60  ;;  %v807_v62 = vcombine.low %v801_v34, %v802_v35 }
  0x5c   : > { %v730_v38 = vrot.slane %v723_v59, %v729_v58  ;;  %v760_v63 = vrot.slane %v753_v36, %v729_v58  ;;  %v787_v39 = vrot.slane %v780_v37, %v729_v58  ;;  %v814_v7 = vrot.slane %v807_v62, %v729_v58 }
  0x5e   : > { %v737_v41 = vrot.slane %v730_v38, %v729_v58  ;;  %v761_v43 = vcombine.high %v760_v63, %v760_v63  ;;  %v794_v44 = vrot.slane %v787_v39, %v729_v58  ;;  %v815_v45 = vcombine.high %v814_v7, %v814_v7 }
  0x60   : > { %v739_v2 = vsel %vm449_vm3, %v737_v41, 0.0  ;;  %v768_v8 = vrot.slane %v761_v43, %v729_v58  ;;  %v795_v5 = vcombine.high %v794_v44, %v794_v44  ;;  %v822_v47 = vrot.slane %v815_v45, %v729_v58 }
  0x61   : > { %v740_v49 = vadd.f32 %v739_v2, %v720_v40 }
  0x62   : > { %v770_v50 = vsel %vm449_vm3, %v768_v8, 0.0  ;;  %v797_v52 = vsel %vm449_vm3, %v795_v5, 0.0  ;;  %v823_v11 = vcombine.high %v822_v47, %v822_v47 }
  0x63   : > { %745 = vst.msk [vmem:[#allocation2] ss:$8 sm:$0x3] %vm1278_vm4, %v740_v49  ;;  %v771_v33 = vadd.f32 %v770_v50, %v750_v46  ;;  %v798_v0 = vadd.f32 %v797_v52, %v777_v1 }
  0x64   : > { %v825_v42 = vsel %vm449_vm3, %v823_v11, 0.0 }
  0x65   : > { %772 = vst.msk [vmem:[#allocation2 + $0x1] ss:$8 sm:$0x3] %vm1278_vm4, %v771_v33  ;;  %799 = vst.msk [vmem:[#allocation2 + $0x2] ss:$8 sm:$0x3] %vm1278_vm4, %v798_v0  ;;  %v826_v10 = vadd.f32 %v825_v42, %v804_v12 }
  0x67   : > { %827 = vst.msk [vmem:[#allocation2 + $0x3] ss:$8 sm:$0x3] %vm1278_vm4, %v826_v10 }
  0x6e   : > { %v837_v53 = vld [vmem:[#allocation2] sm:$0x1f]  ;;  %v838_v56 = vld [vmem:[#allocation2 + $0x8] sm:$0x1f] }
  0x6f   : > { %v839_v57 = vadd.f32 %v838_v56, %v837_v53 }
  0x71   : > { %840 = vst [vmem:[%s441_s16] sm:$0x1f] %v839_v57 }
  0x72 PF: > { %s15_s20 = sadd.s32 1, %s1076_s20   ;;  %s1359_s18 = smov %s1072_s19 }
  0x73   : > { %p12_p5 = scmp.ge.s32.totalorder %s15_s20, 4   ;;  %s1360_s19 = smov %s1362_s21 }
  0x75   :  { %14 = sbr.rel (!%p12_p5) target bundleno = 2 (0x2), region = 94 }

</bundles_post_ra>
